<compile_context>
chip_gen: v6e
topology: v6e:2x2x1
jax: 0.10.0
libtpu: 0.0.40
codegen_flags: <defaults>
</compile_context>

<pallas_src>
import jax
import jax.numpy as jnp
from jax import lax
from jax.experimental import pallas as pl
from jax.experimental.pallas import tpu as pltpu

# ---- problem sizes (small, consistent with the module) ----
B = 2            # num_samples
N = 8            # num_tokens (num_patches + 1)
DIM = 32         # token dim
NUM_HEADS = 4
HEAD_DIM = DIM // NUM_HEADS
# attn_dropout_p = proj_dropout_p = 0.0 -> dropouts are identity (forward/eval no-op)


def self_attention_kernel(x_ref, wq_ref, wk_ref, wv_ref, bq_ref, bk_ref, bv_ref,
                          wp_ref, bp_ref, o_ref, acc_ref):
    # Block shapes (one batch element per step, all heads' weights resident):
    #   x_ref  : (1, N, DIM)   bf16
    #   wq/wk/wv_ref : (H, DIM, hd) bf16     bq/bk/bv_ref : (H, 1, hd) f32
    #   wp_ref : (H, hd, DIM)  bf16          bp_ref       : (1, DIM)   f32
    #   o_ref  : (1, N, DIM)   f32           acc_ref      : (N, DIM)   f32 scratch
    h = pl.program_id(1)
    f32 = jnp.float32
    bf16 = jnp.bfloat16

    @pl.when(h == 0)
    def _():
        acc_ref[...] = jnp.zeros_like(acc_ref)

    x = x_ref[0]                                                    # (N, DIM) bf16

    # Per-head q/k/v projections (1/sqrt(hd) already folded into wq / bq).
    q = jnp.dot(x, wq_ref[h], preferred_element_type=f32) + bq_ref[h]   # (N, hd)
    k = jnp.dot(x, wk_ref[h], preferred_element_type=f32) + bk_ref[h]
    v = jnp.dot(x, wv_ref[h], preferred_element_type=f32) + bv_ref[h]

    # q @ k^T via a last-dim/last-dim contraction -- no explicit transpose.
    s = lax.dot_general(q.astype(bf16), k.astype(bf16),
                        (((1,), (1,)), ((), ())),
                        preferred_element_type=f32)                 # (N, N) f32

    # Numerically stable softmax, all in f32, exact normalization.
    s = s - jnp.max(s, axis=-1, keepdims=True)
    p = jnp.exp(s)
    p = p / jnp.sum(p, axis=-1, keepdims=True)
    # attn_dropout / proj_dropout have p = 0.0 -> identity.

    ctx = jnp.dot(p.astype(bf16), v.astype(bf16),
                  preferred_element_type=f32)                       # (N, hd) f32

    # Head re-merge folded into the projection: per-head partial, accumulated.
    acc_ref[...] += jnp.dot(ctx.astype(bf16), wp_ref[h],
                            preferred_element_type=f32)             # (N, DIM)

    @pl.when(h == pl.num_programs(1) - 1)
    def _():
        o_ref[0] = (acc_ref[...] + bp_ref[...]).astype(o_ref.dtype)


@jax.jit
def self_attention(x, wqkv, bqkv, wproj, bproj):
    """x: (B, N, DIM) f32; wqkv: (DIM, 3*DIM); bqkv: (1, 3*DIM);
    wproj: (DIM, DIM); bproj: (1, DIM) -> (B, N, DIM) f32."""
    b, n, d = x.shape
    nh = NUM_HEADS
    hd = d // nh
    scale = hd ** (-0.5)

    # ---- wrapper-side (one-off, outside the kernel) parameter re-layout ----
    def per_head(w_cols):                        # (DIM, DIM) -> (H, DIM, hd)
        return w_cols.reshape(d, nh, hd).transpose(1, 0, 2)

    wq = per_head(wqkv[:, 0 * d:1 * d] * scale)          # scale folded into Q
    wk = per_head(wqkv[:, 1 * d:2 * d])
    wv = per_head(wqkv[:, 2 * d:3 * d])
    bq = (bqkv[0, 0 * d:1 * d] * scale).reshape(nh, 1, hd)
    bk = bqkv[0, 1 * d:2 * d].reshape(nh, 1, hd)
    bv = bqkv[0, 2 * d:3 * d].reshape(nh, 1, hd)
    wp = wproj.reshape(nh, hd, d)                        # head-merge folded in

    bf16 = jnp.bfloat16
    x_bf = x.astype(bf16)
    wq, wk, wv, wp = (a.astype(bf16) for a in (wq, wk, wv, wp))

    return pl.pallas_call(
        self_attention_kernel,
        out_shape=jax.ShapeDtypeStruct((b, n, d), jnp.float32),
        grid_spec=pltpu.PrefetchScalarGridSpec(
            num_scalar_prefetch=0,
            grid=(b, nh),                                  # (batch, head)
            in_specs=[
                pl.BlockSpec((1, n, d), lambda bi, hi: (bi, 0, 0)),    # x
                pl.BlockSpec((nh, d, hd), lambda bi, hi: (0, 0, 0)),   # wq (resident)
                pl.BlockSpec((nh, d, hd), lambda bi, hi: (0, 0, 0)),   # wk
                pl.BlockSpec((nh, d, hd), lambda bi, hi: (0, 0, 0)),   # wv
                pl.BlockSpec((nh, 1, hd), lambda bi, hi: (0, 0, 0)),   # bq
                pl.BlockSpec((nh, 1, hd), lambda bi, hi: (0, 0, 0)),   # bk
                pl.BlockSpec((nh, 1, hd), lambda bi, hi: (0, 0, 0)),   # bv
                pl.BlockSpec((nh, hd, d), lambda bi, hi: (0, 0, 0)),   # wproj
                pl.BlockSpec((1, d), lambda bi, hi: (0, 0)),           # bproj
            ],
            out_specs=pl.BlockSpec((1, n, d), lambda bi, hi: (bi, 0, 0)),
            scratch_shapes=[pltpu.VMEM((n, d), jnp.float32)],
        ),
        compiler_params=pltpu.CompilerParams(
            dimension_semantics=("parallel", "arbitrary")),
    )(x_bf, wq, wk, wv, bq, bk, bv, wp, bproj)


def reference(x, wqkv, bqkv, wproj, bproj):
    # Pure-JAX f32 mirror of the PyTorch forward (dropout p=0 -> identity).
    b, n, d = x.shape
    h, hd = NUM_HEADS, d // NUM_HEADS
    qkv = x @ wqkv + bqkv[0]                                       # (B, N, 3*DIM)
    qkv = qkv.reshape(b, n, 3, h, hd).transpose(2, 0, 3, 1, 4)
    q, k, v = qkv[0], qkv[1], qkv[2]                               # (B, H, N, hd)
    s = jnp.einsum("bhqd,bhkd->bhqk", q, k) * (hd ** (-0.5))
    a = jax.nn.softmax(s, axis=-1)
    ctx = jnp.einsum("bhqk,bhkd->bhqd", a, v)
    ctx = ctx.transpose(0, 2, 1, 3).reshape(b, n, d)
    return ctx @ wproj + bproj[0]


if __name__ == "__main__":
    key = jax.random.PRNGKey(0)
    kx, k1, k2, k3, k4 = jax.random.split(key, 5)

    x = jax.random.normal(kx, (B, N, DIM), dtype=jnp.float32)
    # Deterministic synthetic parameters (qkv Linear: dim -> 3*dim, bias=True;
    # projection Linear: dim -> dim, bias=True), stored as (in, out).
    wqkv = 0.02 * jax.random.normal(k1, (DIM, 3 * DIM), dtype=jnp.float32)
    bqkv = 0.02 * jax.random.normal(k2, (1, 3 * DIM), dtype=jnp.float32)
    wproj = 0.02 * jax.random.normal(k3, (DIM, DIM), dtype=jnp.float32)
    bproj = 0.02 * jax.random.normal(k4, (1, DIM), dtype=jnp.float32)

    out = self_attention(x, wqkv, bqkv, wproj, bproj)
    out = jax.block_until_ready(out)

    ref = reference(x, wqkv, bqkv, wproj, bproj)
    assert out.shape == (B, N, DIM)
    # Tolerance reflects bf16 MXU operands (f32 accumulation); softmax itself
    # is exact f32 (approx reciprocal removed per review).
    assert jnp.allclose(out, ref, atol=5e-3, rtol=1e-2), "mismatch vs reference"

    print("KERNEL_OK")
</pallas_src>

<mosaic_0001>
module attributes {stable_mosaic.version = 11 : i64} {
  func.func @self_attention_kernel(%arg0: i32, %arg1: i32, %arg2: memref<1x8x32xbf16, #tpu.memory_space<vmem>>, %arg3: memref<4x32x8xbf16, #tpu.memory_space<vmem>>, %arg4: memref<4x32x8xbf16, #tpu.memory_space<vmem>>, %arg5: memref<4x32x8xbf16, #tpu.memory_space<vmem>>, %arg6: memref<4x1x8xf32, #tpu.memory_space<vmem>>, %arg7: memref<4x1x8xf32, #tpu.memory_space<vmem>>, %arg8: memref<4x1x8xf32, #tpu.memory_space<vmem>>, %arg9: memref<4x8x32xbf16, #tpu.memory_space<vmem>>, %arg10: memref<1x32xf32, #tpu.memory_space<vmem>>, %arg11: memref<1x8x32xf32, #tpu.memory_space<vmem>>, %arg12: memref<8x32xf32, #tpu.memory_space<vmem>>) attributes {dimension_semantics = [#tpu.dimension_semantics<parallel>, #tpu.dimension_semantics<arbitrary>], iteration_bounds = array<i64: 2, 4>, scalar_prefetch = 0 : i64, scratch_operands = 1 : i64, tpu.core_type = #tpu.core_type<tc>, window_params = [{transform_indices = @transform_0, window_bounds = array<i64: 1, 8, 32>}, {pipeline_mode = #tpu.pipeline_mode<synchronous>, transform_indices = @transform_1, window_bounds = array<i64: 4, 32, 8>}, {pipeline_mode = #tpu.pipeline_mode<synchronous>, transform_indices = @transform_2, window_bounds = array<i64: 4, 32, 8>}, {pipeline_mode = #tpu.pipeline_mode<synchronous>, transform_indices = @transform_3, window_bounds = array<i64: 4, 32, 8>}, {pipeline_mode = #tpu.pipeline_mode<synchronous>, transform_indices = @transform_4, window_bounds = array<i64: 4, 1, 8>}, {pipeline_mode = #tpu.pipeline_mode<synchronous>, transform_indices = @transform_5, window_bounds = array<i64: 4, 1, 8>}, {pipeline_mode = #tpu.pipeline_mode<synchronous>, transform_indices = @transform_6, window_bounds = array<i64: 4, 1, 8>}, {pipeline_mode = #tpu.pipeline_mode<synchronous>, transform_indices = @transform_7, window_bounds = array<i64: 4, 8, 32>}, {pipeline_mode = #tpu.pipeline_mode<synchronous>, transform_indices = @transform_8, window_bounds = array<i64: 1, 32>}, {transform_indices = @transform_9, window_bounds = array<i64: 1, 8, 32>}]} {
    %c0_i32 = arith.constant 0 : i32
    %0 = arith.cmpi eq, %arg1, %c0_i32 : i32
    %1 = arith.extui %0 : i1 to i32
    %c0_i32_0 = arith.constant 0 : i32
    %2 = arith.cmpi ne, %1, %c0_i32_0 : i32
    scf.if %2 {
      %cst_29 = arith.constant 0.000000e+00 : f32
      %58 = vector.broadcast %cst_29 : f32 to vector<8x32xf32>
      %c0_30 = arith.constant 0 : index
      %c0_31 = arith.constant 0 : index
      %59 = vector.load %arg12[%c0_30, %c0_31] : memref<8x32xf32, #tpu.memory_space<vmem>>, vector<8x32xf32>
      tpu.vector_store %arg12[%c0_30, %c0_31], %58 {strides = array<i32>} : memref<8x32xf32, #tpu.memory_space<vmem>>, vector<8x32xf32>,
    } else {
    }
    %c0 = arith.constant 0 : index
    %c0_1 = arith.constant 0 : index
    %c0_2 = arith.constant 0 : index
    %3 = vector.load %arg2[%c0, %c0_1, %c0_2] : memref<1x8x32xbf16, #tpu.memory_space<vmem>>, vector<1x8x32xbf16>
    %4 = vector.shape_cast %3 : vector<1x8x32xbf16> to vector<8x32xbf16>
    %5 = arith.index_cast %arg1 : i32 to index
    %c0_3 = arith.constant 0 : index
    %c0_4 = arith.constant 0 : index
    %6 = vector.load %arg3[%5, %c0_3, %c0_4] : memref<4x32x8xbf16, #tpu.memory_space<vmem>>, vector<1x32x8xbf16>
    %7 = vector.shape_cast %6 : vector<1x32x8xbf16> to vector<32x8xbf16>
    %cst = arith.constant dense<0.000000e+00> : vector<8x8xf32>
    %8 = tpu.matmul %4, %7, %cst {dimension_numbers = #tpu.dot_dimension_numbers<[1], [0], [0], [1], [0, 0, 1, 1], [], []>} : vector<8x32xbf16>, vector<32x8xbf16>, vector<8x8xf32> -> vector<8x8xf32>
    %9 = arith.index_cast %arg1 : i32 to index
    %c0_5 = arith.constant 0 : index
    %c0_6 = arith.constant 0 : index
    %10 = vector.load %arg6[%9, %c0_5, %c0_6] : memref<4x1x8xf32, #tpu.memory_space<vmem>>, vector<1x1x8xf32>
    %11 = vector.shape_cast %10 : vector<1x1x8xf32> to vector<1x8xf32>
    %12 = vector.broadcast %11 : vector<1x8xf32> to vector<8x8xf32>
    %13 = arith.addf %8, %12 : vector<8x8xf32>
    %14 = arith.index_cast %arg1 : i32 to index
    %c0_7 = arith.constant 0 : index
    %c0_8 = arith.constant 0 : index
    %15 = vector.load %arg4[%14, %c0_7, %c0_8] : memref<4x32x8xbf16, #tpu.memory_space<vmem>>, vector<1x32x8xbf16>
    %16 = vector.shape_cast %15 : vector<1x32x8xbf16> to vector<32x8xbf16>
    %cst_9 = arith.constant dense<0.000000e+00> : vector<8x8xf32>
    %17 = tpu.matmul %4, %16, %cst_9 {dimension_numbers = #tpu.dot_dimension_numbers<[1], [0], [0], [1], [0, 0, 1, 1], [], []>} : vector<8x32xbf16>, vector<32x8xbf16>, vector<8x8xf32> -> vector<8x8xf32>
    %18 = arith.index_cast %arg1 : i32 to index
    %c0_10 = arith.constant 0 : index
    %c0_11 = arith.constant 0 : index
    %19 = vector.load %arg7[%18, %c0_10, %c0_11] : memref<4x1x8xf32, #tpu.memory_space<vmem>>, vector<1x1x8xf32>
    %20 = vector.shape_cast %19 : vector<1x1x8xf32> to vector<1x8xf32>
    %21 = vector.broadcast %20 : vector<1x8xf32> to vector<8x8xf32>
    %22 = arith.addf %17, %21 : vector<8x8xf32>
    %23 = arith.index_cast %arg1 : i32 to index
    %c0_12 = arith.constant 0 : index
    %c0_13 = arith.constant 0 : index
    %24 = vector.load %arg5[%23, %c0_12, %c0_13] : memref<4x32x8xbf16, #tpu.memory_space<vmem>>, vector<1x32x8xbf16>
    %25 = vector.shape_cast %24 : vector<1x32x8xbf16> to vector<32x8xbf16>
    %cst_14 = arith.constant dense<0.000000e+00> : vector<8x8xf32>
    %26 = tpu.matmul %4, %25, %cst_14 {dimension_numbers = #tpu.dot_dimension_numbers<[1], [0], [0], [1], [0, 0, 1, 1], [], []>} : vector<8x32xbf16>, vector<32x8xbf16>, vector<8x8xf32> -> vector<8x8xf32>
    %27 = arith.index_cast %arg1 : i32 to index
    %c0_15 = arith.constant 0 : index
    %c0_16 = arith.constant 0 : index
    %28 = vector.load %arg8[%27, %c0_15, %c0_16] : memref<4x1x8xf32, #tpu.memory_space<vmem>>, vector<1x1x8xf32>
    %29 = vector.shape_cast %28 : vector<1x1x8xf32> to vector<1x8xf32>
    %30 = vector.broadcast %29 : vector<1x8xf32> to vector<8x8xf32>
    %31 = arith.addf %26, %30 : vector<8x8xf32>
    %32 = arith.truncf %13 : vector<8x8xf32> to vector<8x8xbf16>
    %33 = arith.truncf %22 : vector<8x8xf32> to vector<8x8xbf16>
    %cst_17 = arith.constant dense<0.000000e+00> : vector<8x8xf32>
    %34 = tpu.matmul %32, %33, %cst_17 {dimension_numbers = #tpu.dot_dimension_numbers<[1], [1], [0], [0], [0, 0, 1, 0], [], []>} : vector<8x8xbf16>, vector<8x8xbf16>, vector<8x8xf32> -> vector<8x8xf32>
    %cst_18 = arith.constant dense<0xFF800000> : vector<8xf32>
    %35 = vector.multi_reduction <maximumf>, %34, %cst_18 [1] : vector<8x8xf32> to vector<8xf32>
    %36 = vector.shape_cast %35 : vector<8xf32> to vector<8x1xf32>
    %37 = vector.broadcast %36 : vector<8x1xf32> to vector<8x8xf32>
    %38 = arith.subf %34, %37 : vector<8x8xf32>
    %39 = math.exp %38 : vector<8x8xf32>
    %cst_19 = arith.constant dense<0.000000e+00> : vector<8xf32>
    %40 = vector.multi_reduction <add>, %39, %cst_19 [1] : vector<8x8xf32> to vector<8xf32>
    %41 = vector.shape_cast %40 : vector<8xf32> to vector<8x1xf32>
    %42 = vector.broadcast %41 : vector<8x1xf32> to vector<8x8xf32>
    %43 = arith.divf %39, %42 : vector<8x8xf32>
    %44 = arith.truncf %43 : vector<8x8xf32> to vector<8x8xbf16>
    %45 = arith.truncf %31 : vector<8x8xf32> to vector<8x8xbf16>
    %cst_20 = arith.constant dense<0.000000e+00> : vector<8x8xf32>
    %46 = tpu.matmul %44, %45, %cst_20 {dimension_numbers = #tpu.dot_dimension_numbers<[1], [0], [0], [1], [0, 0, 1, 1], [], []>} : vector<8x8xbf16>, vector<8x8xbf16>, vector<8x8xf32> -> vector<8x8xf32>
    %c0_21 = arith.constant 0 : index
    %c0_22 = arith.constant 0 : index
    %47 = vector.load %arg12[%c0_21, %c0_22] : memref<8x32xf32, #tpu.memory_space<vmem>>, vector<8x32xf32>
    %48 = arith.truncf %46 : vector<8x8xf32> to vector<8x8xbf16>
    %49 = arith.index_cast %arg1 : i32 to index
    %c0_23 = arith.constant 0 : index
    %c0_24 = arith.constant 0 : index
    %50 = vector.load %arg9[%49, %c0_23, %c0_24] : memref<4x8x32xbf16, #tpu.memory_space<vmem>>, vector<1x8x32xbf16>
    %51 = vector.shape_cast %50 : vector<1x8x32xbf16> to vector<8x32xbf16>
    %cst_25 = arith.constant dense<0.000000e+00> : vector<8x32xf32>
    %52 = tpu.matmul %48, %51, %cst_25 {dimension_numbers = #tpu.dot_dimension_numbers<[1], [0], [0], [1], [0, 0, 1, 1], [], []>} : vector<8x8xbf16>, vector<8x32xbf16>, vector<8x32xf32> -> vector<8x32xf32>
    %53 = arith.addf %47, %52 : vector<8x32xf32>
    %c0_26 = arith.constant 0 : index
    %c0_27 = arith.constant 0 : index
    %54 = vector.load %arg12[%c0_26, %c0_27] : memref<8x32xf32, #tpu.memory_space<vmem>>, vector<8x32xf32>
    tpu.vector_store %arg12[%c0_26, %c0_27], %53 {strides = array<i32>} : memref<8x32xf32, #tpu.memory_space<vmem>>, vector<8x32xf32>,
    %c3_i32 = arith.constant 3 : i32
    %55 = arith.cmpi eq, %arg1, %c3_i32 : i32
    %56 = arith.extui %55 : i1 to i32
    %c0_i32_28 = arith.constant 0 : i32
    %57 = arith.cmpi ne, %56, %c0_i32_28 : i32
    scf.if %57 {
      %c0_29 = arith.constant 0 : index
      %c0_30 = arith.constant 0 : index
      %58 = vector.load %arg12[%c0_29, %c0_30] : memref<8x32xf32, #tpu.memory_space<vmem>>, vector<8x32xf32>
      %c0_31 = arith.constant 0 : index
      %c0_32 = arith.constant 0 : index
      %59 = vector.load %arg10[%c0_31, %c0_32] : memref<1x32xf32, #tpu.memory_space<vmem>>, vector<1x32xf32>
      %60 = vector.broadcast %59 : vector<1x32xf32> to vector<8x32xf32>
      %61 = arith.addf %58, %60 : vector<8x32xf32>
      %c0_33 = arith.constant 0 : index
      %c0_34 = arith.constant 0 : index
      %c0_35 = arith.constant 0 : index
      %62 = vector.load %arg11[%c0_33, %c0_34, %c0_35] : memref<1x8x32xf32, #tpu.memory_space<vmem>>, vector<1x8x32xf32>
      %63 = vector.shape_cast %62 : vector<1x8x32xf32> to vector<8x32xf32>
      %64 = vector.shape_cast %61 : vector<8x32xf32> to vector<1x8x32xf32>
      tpu.vector_store %arg11[%c0_33, %c0_34, %c0_35], %64 {strides = array<i32>} : memref<1x8x32xf32, #tpu.memory_space<vmem>>, vector<1x8x32xf32>,
    } else {
    }
    return
  }
  func.func @transform_0(%arg0: i32, %arg1: i32) -> (i32, i32, i32) {
    %c0_i32 = arith.constant 0 : i32
    %c0_i32_0 = arith.constant 0 : i32
    %c0_i32_1 = arith.constant 0 : i32
    return %arg0, %c0_i32, %c0_i32_0 : i32, i32, i32
  }
  func.func @transform_1(%arg0: i32, %arg1: i32) -> (i32, i32, i32) {
    %c0_i32 = arith.constant 0 : i32
    %c0_i32_0 = arith.constant 0 : i32
    %c0_i32_1 = arith.constant 0 : i32
    %c0_i32_2 = arith.constant 0 : i32
    return %c0_i32, %c0_i32_0, %c0_i32_1 : i32, i32, i32
  }
  func.func @transform_2(%arg0: i32, %arg1: i32) -> (i32, i32, i32) {
    %c0_i32 = arith.constant 0 : i32
    %c0_i32_0 = arith.constant 0 : i32
    %c0_i32_1 = arith.constant 0 : i32
    %c0_i32_2 = arith.constant 0 : i32
    return %c0_i32, %c0_i32_0, %c0_i32_1 : i32, i32, i32
  }
  func.func @transform_3(%arg0: i32, %arg1: i32) -> (i32, i32, i32) {
    %c0_i32 = arith.constant 0 : i32
    %c0_i32_0 = arith.constant 0 : i32
    %c0_i32_1 = arith.constant 0 : i32
    %c0_i32_2 = arith.constant 0 : i32
    return %c0_i32, %c0_i32_0, %c0_i32_1 : i32, i32, i32
  }
  func.func @transform_4(%arg0: i32, %arg1: i32) -> (i32, i32, i32) {
    %c0_i32 = arith.constant 0 : i32
    %c0_i32_0 = arith.constant 0 : i32
    %c0_i32_1 = arith.constant 0 : i32
    %c0_i32_2 = arith.constant 0 : i32
    return %c0_i32, %c0_i32_0, %c0_i32_1 : i32, i32, i32
  }
  func.func @transform_5(%arg0: i32, %arg1: i32) -> (i32, i32, i32) {
    %c0_i32 = arith.constant 0 : i32
    %c0_i32_0 = arith.constant 0 : i32
    %c0_i32_1 = arith.constant 0 : i32
    %c0_i32_2 = arith.constant 0 : i32
    return %c0_i32, %c0_i32_0, %c0_i32_1 : i32, i32, i32
  }
  func.func @transform_6(%arg0: i32, %arg1: i32) -> (i32, i32, i32) {
    %c0_i32 = arith.constant 0 : i32
    %c0_i32_0 = arith.constant 0 : i32
    %c0_i32_1 = arith.constant 0 : i32
    %c0_i32_2 = arith.constant 0 : i32
    return %c0_i32, %c0_i32_0, %c0_i32_1 : i32, i32, i32
  }
  func.func @transform_7(%arg0: i32, %arg1: i32) -> (i32, i32, i32) {
    %c0_i32 = arith.constant 0 : i32
    %c0_i32_0 = arith.constant 0 : i32
    %c0_i32_1 = arith.constant 0 : i32
    %c0_i32_2 = arith.constant 0 : i32
    return %c0_i32, %c0_i32_0, %c0_i32_1 : i32, i32, i32
  }
  func.func @transform_8(%arg0: i32, %arg1: i32) -> (i32, i32) {
    %c0_i32 = arith.constant 0 : i32
    %c0_i32_0 = arith.constant 0 : i32
    %c0_i32_1 = arith.constant 0 : i32
    return %c0_i32, %c0_i32_0 : i32, i32
  }
  func.func @transform_9(%arg0: i32, %arg1: i32) -> (i32, i32, i32) {
    %c0_i32 = arith.constant 0 : i32
    %c0_i32_0 = arith.constant 0 : i32
    %c0_i32_1 = arith.constant 0 : i32
    return %arg0, %c0_i32, %c0_i32_0 : i32, i32, i32
  }
}

</mosaic_0001>

<bundles_post_ra>
// kernel: squeeze.5
= control target key start
LH: loop header
LB: loop body
LE: loop exit
PB: predicated region body
PF: predicated region fallthrough
CT: control target
= control target key end

     0   :  { %s40_s8 = smov 104   ;;  %vm8_vm0 = vcmask 64512   ;;  %s41_s9 = smov 112   ;;  %s58_s0 = inlined_call_operand.vmem [shape: f32[32], index: 0, kind: input, shape index: {}]   ;;  %s59_s1 = inlined_call_operand.vmem [shape: f32[4,1,8], index: 1, kind: output, shape index: {}]  }
   0x1   :  { %v5_v0 = vld [vmem:[%s58_s0] sm:$0x1]  ;;  %s39_s0 = smov 120  }
   0x2   :  { %6 = vst [vmem:[#allocation1] sm:$0x1] %v5_v0 }
   0x9   :  { %v10_v1 = vld [vmem:[#allocation1] sm:$0x1]  }
   0xa   :  { %v22_v2 = vld [vmem:[#allocation1] sm:$0x1]   ;;  %11 = vrot.lane.b32.xlu0 %v10_v1, %s39_s0 }
   0xb   :  { %23 = vrot.lane.b32.xlu1 %v22_v2, %s40_s8  ;;  %v7_v3 = vld [vmem:[#allocation1] sm:$0x1]  }
   0xc   :  { %v16_v4 = vld [vmem:[#allocation1] sm:$0x1]   ;;  %9 = vst.msk [vmem:[#allocation0] sm:$0x1] %vm8_vm0, %v7_v3  }
   0xe   :  { %17 = vrot.lane.b32.xlu0 %v16_v4, %s41_s9 }
  0x7c   :  { %v12_v5 = vpop.permute.xlu0 %11  }
  0x7d   :  { %v24_v6 = vpop.permute.xlu1 %23   ;;  %15 = vst.msk [vmem:[#allocation0 + $0x1] sm:$0x1] %vm8_vm0, %v12_v5  }
  0x7e   :  { %27 = vst.msk [vmem:[#allocation0 + $0x3] sm:$0x1] %vm8_vm0, %v24_v6  }
  0x80   :  { %v18_v7 = vpop.permute.xlu0 %17  }
  0x81   :  { %21 = vst.msk [vmem:[#allocation0 + $0x2] sm:$0x1] %vm8_vm0, %v18_v7  }
  0x88   :  { %v32_v8 = vld [vmem:[#allocation0] sm:$0xf] }
  0x89   :  { %35 = vst [vmem:[%s59_s1] sm:$0xf] %v32_v8 }

// kernel: self_attention.1
= control target key start
LH: loop header
LB: loop body
LE: loop exit
PB: predicated region body
PF: predicated region fallthrough
CT: control target
= control target key end

     0   :  { %s1330_s0 = inlined_call_operand.vmem [shape: bf16[2,8,32], index: 0, kind: input, shape index: {}]   ;;  %s1331_s1 = inlined_call_operand.vmem [shape: bf16[4,32,8], index: 1, kind: input, shape index: {}]   ;;  %s1332_s2 = inlined_call_operand.vmem [shape: bf16[4,32,8], index: 2, kind: input, shape index: {}]   ;;  %s1333_s3 = inlined_call_operand.vmem [shape: bf16[4,32,8], index: 3, kind: input, shape index: {}]   ;;  %s1334_s4 = inlined_call_operand.vmem [shape: f32[4,1,8], index: 4, kind: input, shape index: {}]   ;;  %s1335_s5 = inlined_call_operand.vmem [shape: f32[4,1,8], index: 5, kind: input, shape index: {}]   ;;  %s1336_s6 = inlined_call_operand.vmem [shape: f32[4,1,8], index: 6, kind: input, shape index: {}]   ;;  %s1337_s7 = inlined_call_operand.vmem [shape: bf16[4,8,32], index: 7, kind: input, shape index: {}]   ;;  %s1338_s8 = inlined_call_operand.vmem [shape: f32[1,32], index: 8, kind: input, shape index: {}]   ;;  %s1339_s9 = inlined_call_operand.hbm [shape: f32[2,8,32], index: 9, kind: output, shape index: {}]  }
   0x1   :  { %1342 = sst [smem:[#allocation8_spill]] %s1330_s0 }
   0x2   :  { %1343 = sst [smem:[#allocation9_spill]] %s1331_s1 }
   0x3   :  { %14 = vsyncpa [#allocation4], 0 }
   0x4   :  { %16 = vsyncpa [#allocation4 + $0x1], 0  ;;  %s1148_s30 = smov 0   ;;  %s1150_s10 = smov 0  }
   0x5   :  { %s1152_s11 = smov 0   ;;  %s1154_s12 = smov 0  }
   0x6   :  { %s1156_s13 = smov 0   ;;  %s1158_s14 = smov 0  }
   0x7   :  { %s1160_s15 = smov 0   ;;  %s1162_s16 = smov 0  }
   0x8 LB: > { %s822_s17 = sadd.s32 4294967295, %s1092_s16   ;;  %s823_s18 = sadd.s32 4294967294, %s1092_s16   ;;  %s1092_s16 = sphi %s1162_s16, %s22_s16   ;;  %s1088_s15 = sphi %s1160_s15, %s1361_s15   ;;  %s1084_s14 = sphi %s1158_s14, %s1360_s14   ;;  %s1080_s13 = sphi %s1156_s13, %s1359_s13   ;;  %s1076_s12 = sphi %s1154_s12, %s1358_s12   ;;  %s1072_s11 = sphi %s1152_s11, %s1357_s11   ;;  %s1068_s10 = sphi %s1150_s10, %s1356_s10   ;;  %s1064_s30 = sphi %s1148_s30, %s1355_s30  }
   0x9   : > { %s31_s19 = sadd.s32 1, %s1084_s14  ;;  %s34_s20 = sadd.s32 1, %s1088_s15 }
   0xa   : > { %p32_p0 = scmp.ge.s32.totalorder %s31_s19, 4  ;;  %p245_p1 = scmp.ne.s32.totalorder %s1072_s11, %s1068_s10 }
   0xb   : > { %p246_p2 = scmp.eq.s32.totalorder %s822_s17, 7  ;;  %p251_p4 = scmp.ne.s32.totalorder %s1068_s10, %s1064_s30 }
   0xc   : > { %s1363_s19 = smov (%p32_p0, %s31_s19), 0  ;;  %s1365_s20 = smov (!%p32_p0, %s34_s20), %s1088_s15 }
   0xd   : > { %1344 = sst [smem:[#allocation6_spill]] %s1363_s19  ;;  %p1197_p3 = por %p246_p2, %p245_p1 }
   0xe   : > { %p36_p5 = scmp.ge.s32.totalorder %s1365_s20, 2  ;;  %p252_p6 = scmp.eq.s32.totalorder %s823_s18, 7 }
   0xf   : > { %p826_p7 = scmp.ge.s32.totalorder %s1092_s16, 1  ;;  %p301_p8 = scmp.lt.s32.totalorder %s1092_s16, 9 }
  0x10   : > { %s1367_s20 = smov (%p36_p5, %s1365_s20), 0  ;;  %p1207_p9 = por %p252_p6, %p251_p4 }
  0x11   : > { %1346 = sst [smem:[#allocation7_spill]] %s1367_s20  ;;  %p302_p10 = pnand %p826_p7, %p301_p8 }
  0x12   : > { %s232_s23 = ssub.s32 %s1088_s15, %s1367_s20  ;;  %s235_s24 = sadd.s32 1, %s1072_s11 }
  0x13   : > { %p233_p11 = scmp.eq.s32.totalorder %s232_s23, 0  ;;  %305 = sbr.rel (%p302_p10) target bundleno = 1180 (0x49c), region = 56 }
  0x14   : > { %s1341_s26 = sand.u32 (!%p302_p10), 1, %s1068_s10   ;;  %p336_p12 = scmp.lt.s32.totalorder (!%p302_p10), %s1080_s13, 1 }
  0x15   : > { %s1215_s25 = scalar_select %p233_p11, %s1072_s11, %s235_s24  }
  0x16   : > { %s1221_s27 = sshll.u32 (!%p302_p10), %s1341_s26, 3  ;;  %s1348_s0 = sld [smem:[#allocation8_spill]] (!%p302_p10) }
  0x17   : > { %p829_p13 = scmp.ne.s32.totalorder (!%p302_p10), %s1076_s12, 0 }
  0x18   : > { %s337_s28 = scalar_select %p336_p12, %s1080_s13, 1 }
  0x19   : > { %344 = sbr.rel (%p829_p13) target bundleno = 32 (0x20), region = 60 }
  0x1a   : > { %s828_s29 = sshll.u32 %s337_s28, 2 }
  0x1c   : > { %s339_s20 = scalar_lea.vmem %s1348_s0, %s828_s29 }
  0x1e   : > { %vm345_vm0 = vcmask 261120   ;;  %v1094_v0 = vmov 0.0  }
  0x1f   : > { %346 = vst.msk [vmem:[#allocation2] sm:$0xff] %vm345_vm0, %v1094_v0 }
  0x20 PF: > { %s856_s24 = sshll.u32 %s1076_s12, 4  ;;  %v1095_v1 = vmov 0.0   ;;  %s1349_s1 = sld [smem:[#allocation9_spill]]  ;;  %vm1096_vm1 = vmmov 0   ;;  %v347_v6 = vld [vmem:[%s339_s20] sm:$0xf] }
  0x21   : > { %882 = vmatprep.subr.bf16.mxu1 %v1095_v1  ;;  %s420_s28 = scalar_lea.vmem %s1332_s2, %s856_s24  ;;  %874 = vmatprep.subr.bf16.mxu0 %v1095_v1  ;;  %s1241_s19 = scalar_lea.vmem %s1333_s3, %s856_s24  ;;  %vm375_vm2 = vcmask 261120   ;;  %vm553_vm3 = vcmask 64512   ;;  %vm616_vm4 = vcmask 1043456  }
  0x22   : > { %v990_v2 = vld [vmem:[%s420_s28 + $0x8] sm:$0xff]   ;;  %886 = vmatprep.mubr.msk.bf16.mxu1 %vm1096_vm1, %v1095_v1  ;;  %878 = vmatprep.mubr.msk.bf16.mxu0 %vm1096_vm1, %v1095_v1  ;;  %v992_v4 = vld [vmem:[%s420_s28] sm:$0xff]   ;;  %s425_s23 = scalar_lea.vmem %s1335_s5, %s1076_s12  ;;  %s355_s20 = scalar_lea.vmem %s1334_s4, %s1076_s12 }
  0x23   : > { %883 = vmatpush3.bf16.msra.mxu1 %v990_v2  ;;  %v837_v7 = vld [vmem:[%s425_s23] ss:$0 sm:$0xff]  ;;  %v994_v22 = vld [vmem:[%s1241_s19 + $0x8] sm:$0xff]   ;;  %p850_p0 = scmp.ne.s32.totalorder %s1076_s12, 3 }
  0x24   : > { %884 = vmatprep.subr.bf16.mxu1 %v1095_v1  ;;  %v832_v12 = vld [vmem:[%s355_s20] ss:$0 sm:$0xff]  ;;  %s1350_s20 = scalar_lea.vmem (!%p850_p0), [#allocation3], %s1221_s27 }
  0x25   : > { %v995_v23 = vld [vmem:[%s1241_s19] sm:$0xff]   ;;  %s848_s19 = sshll.u32 %s1076_s12, 2 }
  0x26   : > { %s350_s18 = scalar_lea.vmem %s1349_s1, %s856_s24  ;;  %s663_s23 = scalar_lea.vmem %s1337_s7, %s848_s19  ;;  %v660_v53 = vld [vmem:[#allocation2] sm:$0xff] }
  0x27   : > { %v991_v3 = vld [vmem:[%s350_s18 + $0x8] sm:$0xff]   ;;  %v993_v5 = vld [vmem:[%s350_s18] sm:$0xff]   ;;  %885 = vmatpush3.bf16.msra.mxu1 %v992_v4  ;;  %s491_s18 = scalar_lea.vmem %s1336_s6, %s1076_s12 }
  0x28   : > { %875 = vmatpush3.bf16.msra.mxu0 %v991_v3  ;;  %898 = vmatprep.subr.bf16.mxu1 %v1095_v1  ;;  %v842_v35 = vld [vmem:[%s491_s18] ss:$0 sm:$0xff] }
  0x29   : > { %876 = vmatprep.subr.bf16.mxu0 %v1095_v1  ;;  %v664_v42 = vld [vmem:[%s663_s23] sm:$0xf] }
  0x2a   : > { %887 = vmatmul.mubr.msk.bf16.vlgmr.msra.gmra.mxu1 %vm375_vm2, %v347_v6  ;;  %v669_v43 = vsel %vm616_vm4, %v664_v42, 0 }
  0x2b   : > { %900 = vmatprep.mubr.msk.bf16.mxu1 %vm1096_vm1, %v1095_v1 }
  0x2c   : > { %877 = vmatpush3.bf16.msra.mxu0 %v993_v5 }
  0x2d   : > { %890 = vmatprep.subr.bf16.mxu0 %v1095_v1 }
  0x2f   : > { %879 = vmatmul.mubr.msk.bf16.vlgmr.msra.gmra.mxu0 %vm375_vm2, %v347_v6 }
  0x30   : > { %894 = vmatprep.mubr.msk.bf16.mxu0 %vm1096_vm1, %v1095_v1  ;;  %891 = vmatpush3.bf16.msra.mxu0 %v994_v22 }
  0x31   : > { %892 = vmatprep.subr.bf16.mxu0 %v1095_v1 }
  0x34   : > { %893 = vmatpush3.bf16.msra.mxu0 %v995_v23 }
  0x35   : > { %904 = vmatprep.subr.bf16.mxu0 %v1095_v1 }
  0x37   : > { %895 = vmatmul.mubr.msk.bf16.vlgmr.msra.gmra.mxu0 %vm375_vm2, %v347_v6 }
  0x38   : > { %906 = vmatprep.mubr.msk.bf16.mxu0 %vm1096_vm1, %v1095_v1 }
  0xea   : > { %v479_v8 = vpop.f32.mrf.mxu1 }
  0xeb   : > { %v480_v9 = vadd.f32 %v837_v7, %v479_v8 }
  0xec   : > { %v888_v11 = vpop.f32.mrf.mxu1 }
  0xed   : > { %v552_v13 = vpack.c.bf16 %v480_v9, %v480_v9 }
  0xee   : > { %v482_v15 = vpop.f32.mrf.mxu1 }
  0xef   : > { %v413_v10 = vpop.f32.mrf.mxu0  ;;  %v558_v16 = vsel %vm553_vm3, %v552_v13, 0 }
  0xf0   : > { %v414_v17 = vadd.f32 %v832_v12, %v413_v10  ;;  %v889_v19 = vpop.f32.mrf.mxu1  ;;  %899 = vmatpush3.bf16.xpose.msra.mxu1 %v558_v16 }
  0xf1   : > { %v880_v14 = vpop.f32.mrf.mxu0  ;;  %910 = vmatprep.subr.bf16.mxu1 %v1095_v1 }
  0xf2   : > { %v551_v21 = vpack.c.bf16 %v414_v17, %v414_v17 }
  0xf3   : > { %v416_v18 = vpop.f32.mrf.mxu0 }
  0xf5   : > { %v881_v20 = vpop.f32.mrf.mxu0 }
  0xf7   : > { %901 = vmatmul.mubr.msk.bf16.vlgmr.msra.gmra.mxu1 %vm553_vm3, %v551_v21  ;;  %v545_v34 = vpop.f32.mrf.mxu0 }
  0xf8   : > { %912 = vmatprep.mubr.msk.bf16.mxu1 %vm1096_vm1, %v1095_v1  ;;  %v546_v36 = vadd.f32 %v842_v35, %v545_v34  ;;  %911 = vmatpush3.bf16.msra.mxu1 %v669_v43 }
  0xf9   : > { %v896_v37 = vpop.f32.mrf.mxu0 }
  0xfa   : > { %v612_v38 = vpack.c.bf16 %v546_v36, %v546_v36 }
  0xfb   : > { %v548_v39 = vpop.f32.mrf.mxu0 }
  0xfc   : > { %v618_v40 = vsel %vm616_vm4, %v612_v38, 0 }
  0xfd   : > { %v897_v41 = vpop.f32.mrf.mxu0  ;;  %905 = vmatpush3.bf16.msra.mxu0 %v618_v40 }
 0x1b7   : > { %v594_v24 = vpop.f32.mrf.mxu1 }
 0x1b8   : > { %v600_v25 = vsel %vm553_vm3, %v594_v24, -inf }
 0x1b9   : > { %601 = vmax.xlane.f32.xlu0 %v600_v25  ;;  %v902_v26 = vpop.f32.mrf.mxu1 }
 0x1bb   : > { %v597_v27 = vpop.f32.mrf.mxu1 }
 0x1bd   : > { %v903_v28 = vpop.f32.mrf.mxu1 }
 0x242   : > { %v602_v29 = vpop.xlane.xlu0 %601 }
 0x243   : > { %v603_v30 = vsub.f32 %v594_v24, %v602_v29 }
 0x245   : > { %v604_v31 = vmul.f32 1.442695, %v603_v30 }
 0x247   : > { %996 = vpow2.f32 %v604_v31 }
 0x254   : > { %v997_v32 = vpop.eup %996 }
 0x255   : > { %v606_v33 = vsel %vm553_vm3, %v997_v32, 0.0 }
 0x256   : > { %607 = vadd.xlane.f32.xlu0 %v606_v33 }
 0x2df   : > { %v608_v44 = vpop.xlane.xlu0 %607 }
 0x2e0   : > { %998 = vrcp.f32 %v608_v44 }
 0x2ed   : > { %v999_v45 = vpop.eup %998 }
 0x2ee   : > { %v610_v46 = vmul.f32 %v999_v45, %v997_v32 }
 0x2f0   : > { %v611_v47 = vpack.c.bf16 %v610_v46, %v610_v46 }
 0x2f2   : > { %907 = vmatmul.mubr.msk.bf16.vlgmr.msra.gmra.mxu0 %vm553_vm3, %v611_v47 }
 0x3b2   : > { %v654_v48 = vpop.f32.mrf.mxu0 }
 0x3b3   : > { %v661_v49 = vpack.c.bf16 %v654_v48, %v654_v48 }
 0x3b4   : > { %v908_v50 = vpop.f32.mrf.mxu0 }
 0x3b5   : > { %913 = vmatmul.mubr.msk.bf16.vlgmr.msra.gmra.mxu1 %vm553_vm3, %v661_v49 }
 0x3b6   : > { %v657_v51 = vpop.f32.mrf.mxu0 }
 0x3b8   : > { %v909_v52 = vpop.f32.mrf.mxu0 }
 0x475   : > { %v705_v54 = vpop.f32.mrf.mxu1 }
 0x476   : > { %v711_v55 = vadd.f32 %v705_v54, %v660_v53 }
 0x477   : > { %v914_v56 = vpop.f32.mrf.mxu1  ;;  %716 = sbr.rel (%p850_p0) target bundleno = 1155 (0x483), region = 64 }
 0x478   : > { %712 = vst.msk [vmem:[#allocation2] sm:$0xff] %vm375_vm2, %v711_v55 }
 0x479   : > { %v708_v57 = vpop.f32.mrf.mxu1 }
 0x47b   : > { %v915_v58 = vpop.f32.mrf.mxu1 }
 0x47c   : > { %v851_v60 = vld [vmem:[%s1338_s8] ss:$0 sm:$0xff] }
 0x47f   : > { %v717_v59 = vld [vmem:[#allocation2] sm:$0xff] }
 0x480   : > { %v725_v61 = vadd.f32 %v851_v60, %v717_v59 }
 0x482   : > { %726 = vst.msk [vmem:[%s1350_s20] sm:$0xff] %vm375_vm2, %v725_v61 }
 0x483 PF: > { %s853_s17 = sshll.u32 %s1080_s13, 7  ;;  %s1351_s19 = scalar_lea.vmem [#allocation3], %s1221_s27 }
 0x484   : > { %s739_s12 = scalar_lea.hbm %s1339_s9, %s853_s17  ;;  %s741_s0 = sshll.u32 %s1351_s19, 4  ;;  %s742_s0 = int_to_ptr.vmem [resolvable:$true] %s741_s0 }
 0x485   : > { %s1352_s26 = sand.u32 1, %s1068_s10   ;;  %s1000_s24 = scalar_lea.vmem %s742_s0, 128 }
 0x486   : > { %s728_s23 = scalar_lea.sflag [#allocation4], %s1352_s26  ;;  %p1001_p1 = scmp.ne.s32.totalorder %s742_s0, %s1000_s24 }
 0x487   : > { %s1097_s28 = smov [#allocation3]  }
 0x488   : > { %p1002_p2 = pnand %p1001_p1, %p1197_p3  ;;  %s1004_s20 = sshll.u32 %s1097_s28, 4  ;;  %s1005_s20 = int_to_ptr.vmem [resolvable:$false] %s1004_s20 }
 0x489   : > { %s1006_s1 = scalar_lea.vmem %s1005_s20, 256  ;;  %p1007_p5 = scmp.lt.s32.totalorder %s742_s0, %s1005_s20 }
 0x48a   : > { %p1003_p4 = pneg %p1002_p2  ;;  %p1008_p6 = scmp.lt.s32.totalorder %s1006_s1, %s1000_s24 }
 0x48c   : > { %p1009_p7 = por %p1008_p6, %p1007_p5 }
 0x48e   : > { %p1010_p8 = pnand %p1009_p7, %p1003_p4 }
 0x490   : > { %1013 = shalt.err (!%p1010_p8)
}
 0x491   : > { %s1014_s13 = scalar_lea.hbm %s739_s12, 128  ;;  %s1018_s29 = scalar_lea.hbm %s1339_s9, 256 }
 0x492   : > { %p1015_p10 = scmp.ne.s32.totalorder %s739_s12, %s1014_s13  ;;  %p1019_p13 = scmp.lt.s32.totalorder %s739_s12, %s1339_s9 }
 0x493   : > { %p1020_p0 = scmp.lt.s32.totalorder %s1018_s29, %s1014_s13 }
 0x494   : > { %p1016_p11 = pnand %p1015_p10, %p1197_p3 }
 0x495   : > { %p1021_p1 = por %p1020_p0, %p1019_p13 }
 0x496   : > { %p1017_p12 = pneg %p1016_p11 }
 0x498   : > { %p1022_p2 = pnand %p1021_p1, %p1017_p12 }
 0x49a   : > { %1025 = shalt.err (!%p1022_p2)
}
 0x49b   : > { %916 = dma.vmem_to_hbm [thread:$0]  (%p1197_p3), %s742_s0, 128, %s739_s12, %s728_s23  }
 0x49c PF: > { %p922_p4 = scmp.ge.s32.totalorder %s1092_s16, 2  ;;  %s753_s1 = sand.u32 1, %s1064_s30  }
 0x49d   : > { %s754_s26 = scalar_lea.sflag [#allocation4], %s753_s1 }
 0x49e   : > { %p919_p5 = pnand %p922_p4, %p1207_p9 }
 0x4a0   : > { %p920_p6 = pneg %p919_p5 }
 0x4a2   : > { %1059 = dma.done.wait (%p920_p6), %s754_s26, 128  }
 0x4a3   : > { %1061 = vsyncadd (%p920_p6), %s754_s26, 4294967168  ;;  %s22_s16 = sadd.s32 1, %s1092_s16   ;;  %s1353_s21 = sld [smem:[#allocation6_spill]] }
 0x4a4   : > { %p19_p7 = scmp.ge.s32.totalorder %s22_s16, 10   ;;  %s1354_s0 = sld [smem:[#allocation7_spill]] }
 0x4a5   : > { %s1355_s30 = smov %s1068_s10  ;;  %s1356_s10 = smov %s1072_s11 }
 0x4a6   : > { %s1357_s11 = smov %s1215_s25  ;;  %s1358_s12 = smov %s1084_s14 }
 0x4a7   : > { %s1359_s13 = smov %s1088_s15  ;;  %21 = sbr.rel (!%p19_p7) target bundleno = 8 (0x8), region = 106 }
 0x4a9   : > { %s1360_s14 = smov %s1353_s21 }
 0x4aa   : > { %s1361_s15 = smov %s1354_s0 }
 0x4ac   :  { %759 = vsyncpa [#allocation4], 1 }
 0x4ad   :  { %761 = vsyncpa [#allocation4 + $0x1], 1 }

</bundles_post_ra>
